<compile_context>
chip_gen: v7x
topology: tpu7x:2x2x1
jax: 0.10.0
libtpu: 0.0.40
codegen_flags: <defaults>
</compile_context>

<pallas_src>
import jax
import jax.numpy as jnp
from jax.experimental import pallas as pl
from jax.experimental.pallas import tpu as pltpu

_LANE = 128
_DEFAULT_TILE_BYTES = 4 * 1024 * 1024   # ~4 MiB per x tile (v6e/v7x sweet spot)
_VMEM_LIMIT_BYTES = 32 * 1024 * 1024    # explicit so large tiles are safe on v5e too


def _round_up(x, m):
    return (x + m - 1) // m * m


def _spatial_se_kernel_2d(x_ref, w_ref, b_ref, o_ref):
    # x_ref: (C, TA) VMEM   input tile (native dtype), batch dim squeezed
    # w_ref: (1, C) VMEM    conv1d weight, resident across grid steps
    # b_ref: (1, 1) SMEM    conv1d bias (scalar)
    # o_ref: (C, TA) VMEM   output tile
    x = x_ref[...]                                                     # (C, TA)
    # 1x1 conv over channels: (1,C)x(C,TA) MXU dot, f32 accumulation.
    conv = jnp.dot(w_ref[...], x, preferred_element_type=jnp.float32)  # (1, TA) f32
    squeeze = jax.nn.sigmoid(conv + b_ref[0, 0])                       # (1, TA) f32
    # Broadcast multiply over the channel (sublane) axis in native dtype.
    o_ref[...] = (x * squeeze.astype(x.dtype)).astype(o_ref.dtype)


def _spatial_se_kernel_batched(x_ref, w_ref, b_ref, o_ref):
    # x_ref: (TB, C, A) VMEM  input tile (native dtype)
    # w_ref: (1, 1, C) VMEM   conv1d weight, resident across grid steps
    # b_ref: (1, 1) SMEM      conv1d bias (scalar)
    # o_ref: (TB, C, A) VMEM  output tile
    x = x_ref[...]                                                     # (TB, C, A)
    tb, c, _ = x_ref.shape
    w = jnp.broadcast_to(w_ref[...], (tb, 1, c))                       # (TB, 1, C)
    # Batched 1x1 conv on the MXU with f32 accumulation (no x-sized f32 temp).
    conv = jnp.einsum("bdc,bca->bda", w, x,
                      preferred_element_type=jnp.float32)              # (TB, 1, A) f32
    squeeze = jax.nn.sigmoid(conv + b_ref[0, 0])                       # (TB, 1, A) f32
    o_ref[...] = (x * squeeze.astype(x.dtype)).astype(o_ref.dtype)


def spatial_se_layer(x, weight, bias, *, tile_bytes=_DEFAULT_TILE_BYTES):
    """x: (B, C, A); weight: (C,); bias: scalar. Matches PyTorch SpatialSELayer."""
    B, C, A = x.shape
    itemsize = jnp.dtype(x.dtype).itemsize
    budget_elems = max(1, tile_bytes // itemsize)

    b2d = jnp.asarray(bias, jnp.float32).reshape(1, 1)                 # (1,1) -> SMEM
    cost = pl.CostEstimate(
        flops=3 * B * C * A,
        transcendentals=B * A,
        bytes_accessed=2 * B * C * A * itemsize + C * itemsize,
    )

    if C * A <= budget_elems:
        # ---- batch-tiled path: pack several batch rows into one block ----
        tb = max(1, budget_elems // (C * A))
        tb = min(tb, max(1, tile_bytes // (4 * A)))   # bound the f32 conv temp too
        tb = min(tb, B)
        w3 = weight.reshape(1, 1, C).astype(x.dtype)
        out = pl.pallas_call(
            _spatial_se_kernel_batched,
            out_shape=jax.ShapeDtypeStruct((B, C, A), x.dtype),
            grid_spec=pltpu.PrefetchScalarGridSpec(
                num_scalar_prefetch=0,
                grid=(pl.cdiv(B, tb),),
                in_specs=[
                    pl.BlockSpec((tb, C, A), lambda b: (b, 0, 0)),
                    pl.BlockSpec((1, 1, C), lambda b: (0, 0, 0)),
                    pl.BlockSpec(memory_space=pltpu.MemorySpace.SMEM),
                ],
                out_specs=pl.BlockSpec((tb, C, A), lambda b: (b, 0, 0)),
            ),
            compiler_params=pltpu.CompilerParams(
                dimension_semantics=("parallel",),
                vmem_limit_bytes=_VMEM_LIMIT_BYTES,
            ),
            cost_estimate=cost,
        )(x, w3, b2d)
    else:
        # ---- spatial-tiled path: (C, TA) blocks, TA lane-dense multiple of 128 ----
        ta = max(_LANE, (budget_elems // C) // _LANE * _LANE)
        ta = min(ta, _round_up(A, _LANE))
        w2 = weight.reshape(1, C).astype(x.dtype)
        out = pl.pallas_call(
            _spatial_se_kernel_2d,
            out_shape=jax.ShapeDtypeStruct((B, C, A), x.dtype),
            grid_spec=pltpu.PrefetchScalarGridSpec(
                num_scalar_prefetch=0,
                grid=(B, pl.cdiv(A, ta)),
                in_specs=[
                    # x tile: squeezed batch dim -> kernel sees (C, TA)
                    pl.BlockSpec((None, C, ta), lambda b, a: (b, 0, a)),
                    # weight: constant index_map -> stays resident in VMEM
                    pl.BlockSpec((1, C), lambda b, a: (0, 0)),
                    # bias: whole (1,1) array in SMEM (scalar read)
                    pl.BlockSpec(memory_space=pltpu.MemorySpace.SMEM),
                ],
                out_specs=pl.BlockSpec((None, C, ta), lambda b, a: (b, 0, a)),
            ),
            compiler_params=pltpu.CompilerParams(
                dimension_semantics=("parallel", "parallel"),
                vmem_limit_bytes=_VMEM_LIMIT_BYTES,
            ),
            cost_estimate=cost,
        )(x, w2, b2d)
    return out


def spatial_se_reference(x, weight, bias):
    """Pure-JAX reference matching the PyTorch module (computed in f32)."""
    xf = x.astype(jnp.float32)
    conv = jnp.einsum("bca,c->ba", xf, weight.astype(jnp.float32)) + bias   # (B, A)
    squeeze = jax.nn.sigmoid(conv)[:, None, :]                              # (B, 1, A)
    return xf * squeeze


def _run_case(key, shape, dtype, tile_bytes=_DEFAULT_TILE_BYTES, tol=1e-5):
    kx, kw, kb = jax.random.split(key, 3)
    B, C, A = shape
    x = jax.random.normal(kx, (B, C, A), dtype=jnp.float32).astype(dtype)
    weight = (jax.random.normal(kw, (C,), dtype=jnp.float32) * 0.4).astype(dtype)
    bias = jax.random.normal(kb, (), dtype=jnp.float32) * 0.1

    out = jax.block_until_ready(spatial_se_layer(x, weight, bias, tile_bytes=tile_bytes))
    ref = spatial_se_reference(x, weight, bias)
    assert out.shape == (B, C, A), f"shape mismatch: {out.shape}"
    assert out.dtype == x.dtype
    assert jnp.allclose(out.astype(jnp.float32), ref, atol=tol, rtol=tol), \
        f"mismatch vs reference for shape={shape} dtype={dtype}"


if __name__ == "__main__":
    root = jax.random.PRNGKey(0)
    k1, k2, k3, k4 = jax.random.split(root, 4)

    # Case 1: nominal small shape (B, C, A) = (2, 4, 16) -> batch-tiled path.
    _run_case(k1, (2, 4, 16), jnp.float32)

    # Case 2: non-multiple-of-128 spatial length; small tile budget forces the
    # spatial-tiled path and exercises the masked partial boundary A-tile.
    _run_case(k2, (3, 8, 300), jnp.float32, tile_bytes=4096)

    # Case 3: bf16 inputs through the batch-tiled path (dtype-aware tiling).
    _run_case(k3, (2, 4, 130), jnp.bfloat16, tol=2e-2)

    # Case 4: batch-tiled path with a partial boundary batch tile (B=5, tb=2).
    _run_case(k4, (5, 4, 128), jnp.float32, tile_bytes=4096)

    print("KERNEL_OK")
</pallas_src>

<mosaic_0001>
module attributes {stable_mosaic.version = 11 : i64} {
  func.func @_spatial_se_kernel_batched(%arg0: i32, %arg1: memref<2x4x16xf32, #tpu.memory_space<vmem>>, %arg2: memref<1x1x4xf32, #tpu.memory_space<vmem>>, %arg3: memref<1x1xf32, #tpu.memory_space<smem>>, %arg4: memref<2x4x16xf32, #tpu.memory_space<vmem>>) attributes {dimension_semantics = [#tpu.dimension_semantics<parallel>], iteration_bounds = array<i64: 1>, scalar_prefetch = 0 : i64, scratch_operands = 0 : i64, tpu.core_type = #tpu.core_type<tc>, window_params = [{transform_indices = @transform_0, window_bounds = array<i64: 2, 4, 16>}, {pipeline_mode = #tpu.pipeline_mode<synchronous>, transform_indices = @transform_1, window_bounds = array<i64: 1, 1, 4>}, {transform_indices = @transform_2, window_bounds = array<i64: 1, 1>}, {transform_indices = @transform_3, window_bounds = array<i64: 2, 4, 16>}]} {
    %c0 = arith.constant 0 : index
    %c0_0 = arith.constant 0 : index
    %c0_1 = arith.constant 0 : index
    %0 = vector.load %arg1[%c0, %c0_0, %c0_1] : memref<2x4x16xf32, #tpu.memory_space<vmem>>, vector<2x4x16xf32>
    %c0_2 = arith.constant 0 : index
    %c0_3 = arith.constant 0 : index
    %c0_4 = arith.constant 0 : index
    %1 = vector.load %arg2[%c0_2, %c0_3, %c0_4] : memref<1x1x4xf32, #tpu.memory_space<vmem>>, vector<1x1x4xf32>
    %2 = vector.shape_cast %1 : vector<1x1x4xf32> to vector<1x1x4xf32>
    %3 = vector.broadcast %2 : vector<1x1x4xf32> to vector<2x1x4xf32>
    "tpu.trace_start"() <{level = 10 : i32, message = "bdc,bca->bda"}> : () -> ()
    %cst = arith.constant dense<0.000000e+00> : vector<2x1x16xf32>
    %4 = tpu.matmul %3, %0, %cst {dimension_numbers = #tpu.dot_dimension_numbers<[2], [1], [1], [2], [0, 0, 0, 1, 1, 2], [0], [0]>} : vector<2x1x4xf32>, vector<2x4x16xf32>, vector<2x1x16xf32> -> vector<2x1x16xf32>
    "tpu.trace_stop"() : () -> ()
    %c0_5 = arith.constant 0 : index
    %c0_6 = arith.constant 0 : index
    %5 = memref.load %arg3[%c0_5, %c0_6] : memref<1x1xf32, #tpu.memory_space<smem>>
    %6 = vector.broadcast %5 : f32 to vector<2x1x16xf32>
    %7 = arith.addf %4, %6 : vector<2x1x16xf32>
    %8 = arith.negf %7 : vector<2x1x16xf32>
    %9 = math.exp %8 : vector<2x1x16xf32>
    %cst_7 = arith.constant 1.000000e+00 : f32
    %10 = vector.broadcast %cst_7 : f32 to vector<2x1x16xf32>
    %11 = arith.addf %10, %9 : vector<2x1x16xf32>
    %12 = arith.divf %10, %11 : vector<2x1x16xf32>
    %13 = vector.broadcast %12 : vector<2x1x16xf32> to vector<2x4x16xf32>
    %14 = arith.mulf %0, %13 : vector<2x4x16xf32>
    %c0_8 = arith.constant 0 : index
    %c0_9 = arith.constant 0 : index
    %c0_10 = arith.constant 0 : index
    %15 = vector.load %arg4[%c0_8, %c0_9, %c0_10] : memref<2x4x16xf32, #tpu.memory_space<vmem>>, vector<2x4x16xf32>
    tpu.vector_store %arg4[%c0_8, %c0_9, %c0_10], %14 {strides = array<i32>} : memref<2x4x16xf32, #tpu.memory_space<vmem>>, vector<2x4x16xf32>,
    return
  }
  func.func @transform_0(%arg0: i32) -> (i32, i32, i32) {
    %c0_i32 = arith.constant 0 : i32
    %c0_i32_0 = arith.constant 0 : i32
    %c0_i32_1 = arith.constant 0 : i32
    return %arg0, %c0_i32, %c0_i32_0 : i32, i32, i32
  }
  func.func @transform_1(%arg0: i32) -> (i32, i32, i32) {
    %c0_i32 = arith.constant 0 : i32
    %c0_i32_0 = arith.constant 0 : i32
    %c0_i32_1 = arith.constant 0 : i32
    %c0_i32_2 = arith.constant 0 : i32
    return %c0_i32, %c0_i32_0, %c0_i32_1 : i32, i32, i32
  }
  func.func @transform_2(%arg0: i32) -> (i32, i32) {
    %c0_i32 = arith.constant 0 : i32
    %c0_i32_0 = arith.constant 0 : i32
    %c0_i32_1 = arith.constant 0 : i32
    return %c0_i32, %c0_i32_0 : i32, i32
  }
  func.func @transform_3(%arg0: i32) -> (i32, i32, i32) {
    %c0_i32 = arith.constant 0 : i32
    %c0_i32_0 = arith.constant 0 : i32
    %c0_i32_1 = arith.constant 0 : i32
    return %arg0, %c0_i32, %c0_i32_0 : i32, i32, i32
  }
}

</mosaic_0001>

<bundles_post_ra>
// kernel: tpu_custom_call.1
= control target key start
LH: loop header
LB: loop body
LE: loop exit
PB: predicated region body
PF: predicated region fallthrough
CT: control target
= control target key end

     0   :  { %9 = vsyncpa [#allocation4], 0  ;;  %s372_s0 = inlined_call_operand.hbm [shape: f32[2,4,16], index: 0, kind: input, shape index: {}]   ;;  %s373_s1 = inlined_call_operand.vmem [shape: f32[1,1,4], index: 1, kind: input, shape index: {}]   ;;  %s374_s2 = inlined_call_operand.<no memory space> [shape: f32[1,1], index: 2, kind: input, shape index: {}]   ;;  %s375_s3 = inlined_call_operand.hbm [shape: f32[2,4,16], index: 3, kind: output, shape index: {}]  }
   0x1   :  { %10 = vsyncpa [#allocation5], 0  ;;  %s310_s12 = smov [#allocation3]   ;;  %s262_s16 = scalar_lea.hbm %s372_s0, 128 }
   0x2   :  { %s16_s13 = sshll.u32 %s310_s12, 4  ;;  %p263_p0 = scmp.ne.s32.totalorder %s372_s0, %s262_s16  ;;  %s17_s13 = int_to_ptr.vmem [resolvable:$true] %s16_s13 }
   0x3   :  { %p266_p1 = scmp.lt.u32.totalorder %s262_s16, %s372_s0 }
   0x5   :  { %p268_p2 = pnand %p266_p1, %p263_p0 }
   0x7   :  { %271 = shalt.err (!%p268_p2)
}
   0x8   :  { %s272_s21 = scalar_lea.vmem %s17_s13, 128  ;;  %p277_p4 = scmp.lt.s32.totalorder %s17_s13, %s17_s13 }
   0x9   :  { %p273_p3 = scmp.ne.s32.totalorder %s17_s13, %s272_s21  ;;  %p278_p5 = scmp.lt.s32.totalorder %s272_s21, %s272_s21 }
   0xb   :  { %p279_p6 = por %p278_p5, %p277_p4 }
   0xd   :  { %p280_p7 = pnand %p279_p6, %p273_p3 }
   0xf   :  { %283 = shalt.err (!%p280_p7)
}
  0x10   :  { %s311_s22 = smov 64   ;;  %s312_s23 = smov 4  }
  0x11   :  { %22 = dma.hbm_to_vmem [thread:$0]  %s372_s0, 128, %s17_s13, [#allocation4], %s311_s22, %s311_s22, %s312_s23  }
  0x12   :  { %306 = dma.done.wait [#allocation4], 128  }
  0x13   :  { %307 = vsyncadd [#allocation4], 4294967168  ;;  %v313_v0 = vmov 0.0   ;;  %vm314_vm0 = vmmov 0   ;;  %vm39_vm1 = vcmask 1043456   ;;  %vm35_vm2 = vcmask 31744  }
  0x14   :  { %238 = vmatprep.subr.mxu0 %v313_v0  ;;  %243 = vmatprep.subr.mxu1 %v313_v0  ;;  %v30_v1 = vld [vmem:[#allocation3] sm:$0xf]  ;;  %v31_v2 = vld [vmem:[#allocation3 + $0x4] sm:$0xf]  ;;  %v34_v4 = vstv %s374_s2  ;;  %v198_v17 = vlaneseq  ;;  %vm208_vm3 = vcmask 125952  }
  0x15   :  { %240 = vmatprep.mubr.msk.f32.mxu0 %vm314_vm0, %v313_v0  ;;  %245 = vmatprep.mubr.msk.f32.mxu1 %vm314_vm0, %v313_v0  ;;  %v32_v3 = vld [vmem:[%s373_s1] sm:$0x1]  ;;  %s315_s1 = smov [#allocation6]  }
  0x16   :  { %239 = vmatpush3.msk.msra.mxu0 %vm39_vm1, %v30_v1  ;;  %244 = vmatpush3.msk.msra.mxu1 %vm39_vm1, %v31_v2  ;;  %v199_v18 = vshrl.u32 %v198_v17, 7  ;;  %s216_s2 = sshll.u32 %s315_s1, 4  ;;  %s217_s2 = int_to_ptr.vmem [resolvable:$true] %s216_s2 }
  0x17   :  { %241 = vmatmul.mubr.msk.f32.vlgmr.msra.gmra.mrb[0].mxu0 %vm35_vm2, %v32_v3  ;;  %246 = vmatmul.mubr.msk.f32.vlgmr.msra.gmra.mrb[0].mxu1 %vm35_vm2, %v32_v3  ;;  %s284_s29 = scalar_lea.vmem %s217_s2, 128  ;;  %p289_p9 = scmp.lt.s32.totalorder %s217_s2, %s217_s2 }
  0x18   :  { %v200_v19 = vsub.s32 0, %v199_v18  ;;  %p285_p8 = scmp.ne.s32.totalorder %s217_s2, %s284_s29  ;;  %p290_p10 = scmp.lt.s32.totalorder %s284_s29, %s284_s29 }
  0x1a   :  { %p291_p11 = por %p290_p10, %p289_p9 }
  0x1c   :  { %p292_p12 = pnand %p291_p11, %p285_p8 }
  0xea   :  { %v109_v5 = vpop.f32.mrb[0].mxu0  ;;  %v182_v6 = vpop.f32.mrb[0].mxu1 }
  0xeb   :  { %v110_v7 = vadd.f32 %v109_v5, %v34_v4  ;;  %v183_v8 = vadd.f32 %v182_v6, %v34_v4  ;;  %v242_v9 = vpop.f32.mrb[1].mxu0  ;;  %v247_v10 = vpop.f32.mrb[1].mxu1 }
  0xed   :  { %v232_v11 = vmul.f32 -1.442695, %v110_v7  ;;  %v233_v12 = vmul.f32 -1.442695, %v183_v8 }
  0xef   :  { %254 = vpow2.f32 %v232_v11 }
  0xf0   :  { %256 = vpow2.f32 %v233_v12 }
  0xf9   :  { %v255_v13 = vpop.eup %254 }
  0xfa   :  { %v257_v14 = vpop.eup %256  ;;  %v192_v15 = vadd.f32 1.0, %v255_v13 }
  0xfb   :  { %v193_v16 = vadd.f32 1.0, %v257_v14 }
  0xfc   :  { %258 = vrcp.f32 %v192_v15 }
  0xfd   :  { %260 = vrcp.f32 %v193_v16 }
 0x106   :  { %v259_v20 = vpop.eup %258 }
 0x107   :  { %v261_v21 = vpop.eup %260  ;;  %v201_v22 = vrot.slane %v259_v20, %v200_v19 }
 0x108   :  { %v205_v23 = vrot.slane %v261_v21, %v200_v19 }
 0x109   :  { %v206_v24 = vmul.f32 %v201_v22, %v30_v1 }
 0x10a   :  { %v207_v25 = vmul.f32 %v205_v23, %v31_v2 }
 0x10b   :  { %209 = vst.msk [vmem:[#allocation6] sm:$0xf] %vm208_vm3, %v206_v24 }
 0x10c   :  { %210 = vst.msk [vmem:[#allocation6 + $0x4] sm:$0xf] %vm208_vm3, %v207_v25 }
 0x10d   :  { %295 = shalt.err (!%p292_p12)
}
 0x10e   :  { %s296_s5 = scalar_lea.hbm %s375_s3, 128 }
 0x10f   :  { %p297_p13 = scmp.ne.s32.totalorder %s375_s3, %s296_s5  ;;  %p300_p0 = scmp.lt.u32.totalorder %s296_s5, %s375_s3 }
 0x111   :  { %p302_p1 = pnand %p300_p0, %p297_p13 }
 0x113   :  { %305 = shalt.err (!%p302_p1)
}
 0x114   :  { %222 = dma.vmem_to_hbm [thread:$0]  %s217_s2, 128, %s375_s3, [#allocation5], %s311_s22, %s311_s22, %s312_s23  }
 0x115   :  { %308 = dma.done.wait [#allocation5], 128  }
 0x116   :  { %309 = vsyncadd [#allocation5], 4294967168 }
 0x117   :  { %226 = vsyncpa [#allocation4], 1 }
 0x118   :  { %227 = vsyncpa [#allocation5], 1 }

</bundles_post_ra>
